<compile_context>
chip_gen: v7x
topology: tpu7x:2x2x1
jax: 0.10.0
libtpu: 0.0.40
codegen_flags: <defaults>
</compile_context>

<pallas_src>
import jax
import jax.numpy as jnp
from jax.experimental import pallas as pl
from jax.experimental.pallas import tpu as pltpu

_LANES = 512            # slab lane width: multiple of 128 and divides 3*64*64
_MAX_TILE_ROWS = 4096   # ~4 MiB bf16 in / 8 MiB f32 out per block (~24 MiB dbl-buffered)
_TINY_INPUT_BYTES = 1 << 20  # below this, XLA's fused convert beats a pallas_call


def _round_up(v, m):
    return ((v + m - 1) // m) * m


def _cast_copy_kernel(x_ref, o_ref):
    # Elementwise cast to float32 (the `.float()` in the PyTorch forward).
    o_ref[...] = x_ref[...].astype(jnp.float32)


def _cast_copy_2d(x2d):
    """Cast/copy a lane-dense (R, 512) slab to float32 with a Pallas kernel."""
    R, C = x2d.shape

    # Balanced tiling: at least 2 (ideally even) near-equal blocks so the
    # "parallel" row axis can shard across both v7x TensorCores, capped so a
    # block never exceeds _MAX_TILE_ROWS rows.
    n_steps = max(2, pl.cdiv(R, _MAX_TILE_ROWS))
    if n_steps % 2:
        n_steps += 1
    tile_rows = min(R, _round_up(pl.cdiv(R, n_steps), 8))
    grid = (pl.cdiv(R, tile_rows),)

    in_bytes = jnp.dtype(x2d.dtype).itemsize
    return pl.pallas_call(
        _cast_copy_kernel,
        out_shape=jax.ShapeDtypeStruct((R, C), jnp.float32),
        grid_spec=pltpu.PrefetchScalarGridSpec(
            num_scalar_prefetch=0,
            grid=grid,
            in_specs=[pl.BlockSpec((tile_rows, C), lambda i: (i, 0))],
            out_specs=pl.BlockSpec((tile_rows, C), lambda i: (i, 0)),
        ),
        compiler_params=pltpu.CompilerParams(
            dimension_semantics=("parallel",),
            vmem_limit_bytes=32 * 1024 * 1024,
        ),
        cost_estimate=pl.CostEstimate(
            flops=0,
            transcendentals=0,
            bytes_accessed=R * C * (in_bytes + 4),
        ),
    )(x2d)


def animal_student_net_forward(x, *, min_kernel_bytes=_TINY_INPUT_BYTES):
    """JAX/Pallas equivalent of AnimalStudentNet.forward.

    Accepts any array whose total element count is a multiple of 3*64*64 and
    returns a float32 array of shape (-1, 3, 64, 64).
    """
    total = x.size
    chw = 3 * 64 * 64
    assert total % chw == 0, "input not viewable as (-1, 3, 64, 64)"
    n = total // chw

    if x.dtype == jnp.float32:
        # `.float()` on f32 is a no-op; the view is metadata only. Skipping the
        # kernel avoids a pointless HBM round trip.
        return x.reshape(n, 3, 64, 64)

    if total * jnp.dtype(x.dtype).itemsize < min_kernel_bytes:
        # Tiny input: pallas_call launch + pipeline prologue dominates; the
        # fused XLA convert is strictly cheaper here.
        return x.astype(jnp.float32).reshape(n, 3, 64, 64)

    # total = n * 12288 = n * 24 * 512 -> (24n, 512): lane-dense slab whose row
    # count is always a multiple of 8, so every block is (8,128)-aligned.
    x2d = x.reshape(total // _LANES, _LANES)
    y2d = _cast_copy_2d(x2d)

    # Metadata-only reshape back to the NCHW view the PyTorch module returns.
    return y2d.reshape(n, 3, 64, 64)


if __name__ == "__main__":
    key = jax.random.PRNGKey(0)
    # Small input consistent with the forward: batch=2, NCHW (2, 3, 64, 64).
    # bf16 input so the `.float()` cast is a real compute step.
    x = jax.random.normal(key, (2, 3, 64, 64), dtype=jnp.float32).astype(
        jnp.bfloat16
    )
    ref = x.astype(jnp.float32).reshape(-1, 3, 64, 64)

    # 1) Default path: tiny input falls back to the fused XLA convert.
    y_fast = animal_student_net_forward(x)
    jax.block_until_ready(y_fast)
    assert y_fast.shape == (2, 3, 64, 64), y_fast.shape
    assert y_fast.dtype == jnp.float32, y_fast.dtype
    assert jnp.array_equal(y_fast, ref)

    # 2) Force the Pallas kernel path (min_kernel_bytes=0) to exercise it at a
    #    small shape: (48, 512) slab, balanced 2-step grid of (24, 512) blocks.
    y_kernel = animal_student_net_forward(x, min_kernel_bytes=0)
    jax.block_until_ready(y_kernel)
    assert y_kernel.shape == (2, 3, 64, 64), y_kernel.shape
    assert y_kernel.dtype == jnp.float32, y_kernel.dtype
    assert jnp.array_equal(y_kernel, ref)

    # 3) f32 fast path (no kernel needed, metadata reshape only).
    y32 = animal_student_net_forward(x.astype(jnp.float32))
    jax.block_until_ready(y32)
    assert jnp.array_equal(y32, ref)

    print("KERNEL_OK")
</pallas_src>

<mosaic_0001>
module attributes {stable_mosaic.version = 11 : i64} {
  func.func @_cast_copy_kernel(%arg0: i32, %arg1: memref<24x512xbf16, #tpu.memory_space<vmem>>, %arg2: memref<24x512xf32, #tpu.memory_space<vmem>>) attributes {dimension_semantics = [#tpu.dimension_semantics<parallel>], iteration_bounds = array<i64: 2>, scalar_prefetch = 0 : i64, scratch_operands = 0 : i64, tpu.core_type = #tpu.core_type<tc>, window_params = [{transform_indices = @transform_0, window_bounds = array<i64: 24, 512>}, {transform_indices = @transform_1, window_bounds = array<i64: 24, 512>}]} {
    %c0 = arith.constant 0 : index
    %c0_0 = arith.constant 0 : index
    %0 = vector.load %arg1[%c0, %c0_0] : memref<24x512xbf16, #tpu.memory_space<vmem>>, vector<24x512xbf16>
    %1 = arith.extf %0 : vector<24x512xbf16> to vector<24x512xf32>
    %c0_1 = arith.constant 0 : index
    %c0_2 = arith.constant 0 : index
    %2 = vector.load %arg2[%c0_1, %c0_2] : memref<24x512xf32, #tpu.memory_space<vmem>>, vector<24x512xf32>
    tpu.vector_store %arg2[%c0_1, %c0_2], %1 {strides = array<i32>} : memref<24x512xf32, #tpu.memory_space<vmem>>, vector<24x512xf32>,
    return
  }
  func.func @transform_0(%arg0: i32) -> (i32, i32) {
    %c0_i32 = arith.constant 0 : i32
    %c0_i32_0 = arith.constant 0 : i32
    return %arg0, %c0_i32 : i32, i32
  }
  func.func @transform_1(%arg0: i32) -> (i32, i32) {
    %c0_i32 = arith.constant 0 : i32
    %c0_i32_0 = arith.constant 0 : i32
    return %arg0, %c0_i32 : i32, i32
  }
}

</mosaic_0001>

<bundles_post_ra>
// kernel: tpu_custom_call.1
= control target key start
LH: loop header
LB: loop body
LE: loop exit
PB: predicated region body
PF: predicated region fallthrough
CT: control target
= control target key end

     0   :  { %6 = vsyncpa [#allocation3], 0  ;;  %s596_s0 = inlined_call_operand.hbm [shape: bf16[48,512], index: 0, kind: input, shape index: {}]   ;;  %s597_s1 = inlined_call_operand.hbm [shape: f32[48,512], index: 1, kind: output, shape index: {}]  }
   0x1   :  { %8 = vsyncpa [#allocation3 + $0x1], 0 }
   0x2   :  { %9 = vsyncpa [#allocation4], 0 }
   0x3   :  { %11 = vsyncpa [#allocation4 + $0x1], 0  ;;  %s439_s6 = smov 0   ;;  %s441_s7 = smov 0  }
   0x4   :  { %s443_s8 = smov 0   ;;  %s445_s9 = smov 0  }
   0x5 LB: > { %s460_s10 = sadd.s32 4294967295, %s421_s9   ;;  %s256_s11 = sadd.s32 4294967294, %s421_s9   ;;  %s421_s9 = sphi %s445_s9, %s609_s9   ;;  %s417_s8 = sphi %s443_s8, %s608_s8   ;;  %s413_s7 = sphi %s441_s7, %s607_s7   ;;  %s409_s6 = sphi %s439_s6, %s606_s6  }
   0x6   : > { %s464_s12 = sadd.s32 1, %s421_s9   ;;  %s24_s13 = sadd.s32 1, %s417_s8 }
   0x7   : > { %s21_s14 = ssub.s32 %s421_s9, %s464_s12  ;;  %p31_p0 = scmp.ne.s32.totalorder %s417_s8, %s413_s7 }
   0x8   : > { %p22_p1 = scmp.eq.s32.totalorder %s21_s14, 0  ;;  %p32_p2 = scmp.eq.s32.totalorder %s421_s9, 0 }
   0x9   : > { %p37_p3 = scmp.ne.s32.totalorder %s413_s7, %s409_s6  ;;  %p38_p4 = scmp.eq.s32.totalorder %s460_s10, 0 }
   0xa   : > { %s476_s15 = scalar_select %p22_p1, %s417_s8, %s24_s13  }
   0xb   : > { %p33_p5 = por %p32_p2, %p31_p0  ;;  %p478_p6 = por %p38_p4, %p37_p3 }
   0xc   : > { %p61_p7 = scmp.eq.s32.totalorder %s460_s10, 1  ;;  %p67_p8 = scmp.eq.s32.totalorder %s256_s11, 1 }
   0xd   : > { %p287_p10 = scmp.lt.s32.totalorder %s421_s9, 2  ;;  %s87_s19 = sand.u32 1, %s417_s8  }
   0xe   : > { %p485_p11 = por %p61_p7, %p31_p0  ;;  %p489_p12 = por %p67_p8, %p37_p3 }
   0xf   : > { %s270_s20 = smul.u32 768, %s421_s9  ;;  %p500_p13 = pnand %p287_p10, %p33_p5 }
  0x10   : > { %s600_s17 = scalar_select %p485_p11, 1, 0 }
  0x11   : > { %s601_s18 = scalar_select %p489_p12, 1, 0 }
  0x12   : > { %s272_s21 = smul.u32 48, %s87_s19  ;;  %s498_s24 = scalar_lea.hbm %s596_s0, %s270_s20 }
  0x13   : > { %s506_s28 = scalar_lea.sflag [#allocation3], %s87_s19  ;;  %s325_s29 = scalar_lea.hbm %s498_s24, 768 }
  0x14   : > { %s91_s26 = scalar_lea.vmem [#allocation2], %s272_s21  ;;  %p326_p0 = scmp.ne.s32.totalorder %s498_s24, %s325_s29 }
  0x15   : > { %s99_s27 = sshll.u32 %s91_s26, 4  ;;  %p327_p1 = pneg %p500_p13  ;;  %s504_s27 = int_to_ptr.vmem [resolvable:$true] %s99_s27 }
  0x16   : > { %s330_s3 = scalar_lea.hbm %s596_s0, 1536  ;;  %p331_p4 = scmp.lt.u32.totalorder %s498_s24, %s596_s0 }
  0x17   : > { %p328_p2 = pnand %p327_p1, %p326_p0  ;;  %p332_p5 = scmp.lt.u32.totalorder %s330_s3, %s325_s29 }
  0x18   : > { %p334_p8 = scmp.lt.u32.totalorder %s325_s29, %s498_s24 }
  0x19   : > { %p329_p3 = pneg %p328_p2  ;;  %p333_p7 = por %p332_p5, %p331_p4 }
  0x1b   : > { %p335_p10 = por %p334_p8, %p333_p7 }
  0x1d   : > { %p336_p9 = pnand %p335_p10, %p329_p3 }
  0x1f   : > { %339 = shalt.err (!%p336_p9)
}
  0x20   : > { %s340_s11 = scalar_lea.vmem %s504_s27, 768  ;;  %s423_s13 = smov [#allocation2]  }
  0x21   : > { %p341_p0 = scmp.ne.s32.totalorder %s504_s27, %s340_s11  ;;  %s345_s14 = sshll.u32 %s423_s13, 4  ;;  %s346_s14 = int_to_ptr.vmem [resolvable:$false] %s345_s14 }
  0x22   : > { %s347_s19 = scalar_lea.vmem %s346_s14, 1536  ;;  %p348_p11 = scmp.lt.s32.totalorder %s504_s27, %s346_s14 }
  0x23   : > { %p343_p2 = pnand %p341_p0, %p327_p1  ;;  %p349_p4 = scmp.lt.s32.totalorder %s347_s19, %s340_s11 }
  0x25   : > { %p344_p12 = pneg %p343_p2  ;;  %p350_p5 = por %p349_p4, %p348_p11 }
  0x27   : > { %p351_p7 = pnand %p350_p5, %p344_p12 }
  0x29   : > { %354 = shalt.err (!%p351_p7)
}
  0x2a   : > { %s424_s20 = smov 256   ;;  %s425_s21 = smov 16  }
  0x2b   : > { %282 = dma.hbm_to_vmem [thread:$0]  (!%p500_p13), %s498_s24, 768, %s504_s27, %s506_s28, %s424_s20, %s424_s20, %s425_s21  }
  0x2c   : > { %p261_p9 = scmp.ge.s32.totalorder %s421_s9, 1  ;;  %p107_p1 = scmp.lt.s32.totalorder %s421_s9, 3 }
  0x2e   : > { %p108_p3 = pnand %p261_p9, %p107_p1 }
  0x2f   : > { %s537_s22 = sand.u32 (!%p108_p3), 1, %s413_s7  }
  0x30   : > { %111 = sbr.rel (%p108_p3) target bundleno = 83 (0x53), region = 24  ;;  %s114_s26 = scalar_lea.sflag (!%p108_p3), [#allocation3], %s537_s22 }
  0x31   : > { %s273_s23 = smul.u32 (!%p108_p3), 48, %s537_s22 }
  0x33   : > { %s117_s29 = scalar_lea.vmem (!%p108_p3), [#allocation2], %s273_s23 }
  0x37   : > { %400 = dma.done.wait (%p478_p6), %s114_s26, 768  }
  0x38   : > { %402 = vsyncadd (%p478_p6), %s114_s26, 4294966528  ;;  %s274_s24 = smul.u32 96, %s537_s22  ;;  %v138_v0 = vld [vmem:[%s117_s29] sm:$0xff]  ;;  %v139_v1 = vld [vmem:[%s117_s29 + $0x8] sm:$0xff]  ;;  %s169_s2 = scalar_lea.sflag [#allocation4], %s537_s22 }
  0x39   : > { %s271_s25 = smul.u32 1536, %s460_s10  ;;  %v140_v2 = vld [vmem:[%s117_s29 + $0x10] sm:$0xff]  ;;  %v144_v3 = vunpack.c.l.bf16 %v138_v0  ;;  %v145_v4 = vunpack.c.h.bf16 %v138_v0  ;;  %v146_v5 = vunpack.c.l.bf16 %v139_v1  ;;  %v147_v6 = vunpack.c.h.bf16 %v139_v1  ;;  %v141_v7 = vld [vmem:[%s117_s29 + $0x18] sm:$0xff]  ;;  %v142_v8 = vld [vmem:[%s117_s29 + $0x20] sm:$0xff]  ;;  %p603_p11 = scmp.ne.s32.totalorder %s600_s17, 0 }
  0x3a   : > { %s135_s27 = scalar_lea.vmem [#allocation5], %s274_s24  ;;  %v143_v9 = vld [vmem:[%s117_s29 + $0x28] sm:$0xff]  ;;  %v148_v10 = vunpack.c.l.bf16 %v140_v2  ;;  %v149_v11 = vunpack.c.h.bf16 %v140_v2  ;;  %v150_v12 = vunpack.c.l.bf16 %v141_v7  ;;  %v151_v13 = vunpack.c.h.bf16 %v141_v7  ;;  %s426_s4 = smov [#allocation5]  }
  0x3b   : > { %s183_s28 = sshll.u32 %s135_s27, 4  ;;  %156 = vst [vmem:[%s135_s27] sm:$0xff] %v144_v3  ;;  %157 = vst [vmem:[%s135_s27 + $0x8] sm:$0xff] %v145_v4  ;;  %v152_v14 = vunpack.c.l.bf16 %v142_v8  ;;  %v153_v15 = vunpack.c.h.bf16 %v142_v8  ;;  %v154_v16 = vunpack.c.l.bf16 %v143_v9  ;;  %v155_v17 = vunpack.c.h.bf16 %v143_v9  ;;  %s550_s30 = scalar_lea.hbm %s597_s1, %s271_s25  ;;  %s552_s28 = int_to_ptr.vmem [resolvable:$true] %s183_s28 }
  0x3c   : > { %158 = vst [vmem:[%s135_s27 + $0x10] sm:$0xff] %v146_v5  ;;  %159 = vst [vmem:[%s135_s27 + $0x18] sm:$0xff] %v147_v6  ;;  %s355_s3 = scalar_lea.vmem %s552_s28, 1536  ;;  %s359_s5 = sshll.u32 %s426_s4, 4  ;;  %s360_s5 = int_to_ptr.vmem [resolvable:$false] %s359_s5 }
  0x3d   : > { %160 = vst [vmem:[%s135_s27 + $0x20] sm:$0xff] %v148_v10  ;;  %161 = vst [vmem:[%s135_s27 + $0x28] sm:$0xff] %v149_v11  ;;  %p356_p6 = scmp.ne.s32.totalorder %s552_s28, %s355_s3  ;;  %s361_s11 = scalar_lea.vmem %s360_s5, 3072 }
  0x3e   : > { %162 = vst [vmem:[%s135_s27 + $0x30] sm:$0xff] %v150_v12  ;;  %163 = vst [vmem:[%s135_s27 + $0x38] sm:$0xff] %v151_v13  ;;  %p362_p8 = scmp.lt.s32.totalorder %s552_s28, %s360_s5  ;;  %p363_p10 = scmp.lt.s32.totalorder %s361_s11, %s355_s3 }
  0x3f   : > { %164 = vst [vmem:[%s135_s27 + $0x40] sm:$0xff] %v152_v14  ;;  %165 = vst [vmem:[%s135_s27 + $0x48] sm:$0xff] %v153_v15  ;;  %p357_p12 = pnand %p356_p6, %p603_p11 }
  0x40   : > { %166 = vst [vmem:[%s135_s27 + $0x50] sm:$0xff] %v154_v16  ;;  %167 = vst [vmem:[%s135_s27 + $0x58] sm:$0xff] %v155_v17  ;;  %p364_p0 = por %p363_p10, %p362_p8 }
  0x41   : > { %p358_p13 = pneg %p357_p12 }
  0x43   : > { %p365_p2 = pnand %p364_p0, %p358_p13 }
  0x45   : > { %368 = shalt.err (!%p365_p2)
}
  0x46   : > { %s369_s13 = scalar_lea.hbm %s550_s30, 1536  ;;  %s373_s20 = scalar_lea.hbm %s597_s1, 3072 }
  0x47   : > { %p370_p4 = scmp.ne.s32.totalorder %s550_s30, %s369_s13  ;;  %p374_p9 = scmp.lt.u32.totalorder %s550_s30, %s597_s1 }
  0x48   : > { %p375_p1 = scmp.lt.u32.totalorder %s373_s20, %s369_s13  ;;  %p377_p6 = scmp.lt.u32.totalorder %s369_s13, %s550_s30 }
  0x49   : > { %p371_p5 = pnand %p370_p4, %p603_p11 }
  0x4a   : > { %p376_p3 = por %p375_p1, %p374_p9 }
  0x4b   : > { %p372_p7 = pneg %p371_p5 }
  0x4c   : > { %p378_p12 = por %p377_p6, %p376_p3 }
  0x4e   : > { %p379_p13 = pnand %p378_p12, %p372_p7 }
  0x50   : > { %382 = shalt.err (!%p379_p13)
}
  0x51   : > { %s427_s26 = smov 512   ;;  %s428_s29 = smov 32  }
  0x52   : > { %277 = dma.vmem_to_hbm [thread:$0]  (%p603_p11), %s552_s28, 1536, %s550_s30, %s169_s2, %s427_s26, %s427_s26, %s428_s29  }
  0x53 PF: > { %s198_s24 = sand.u32 1, %s409_s6   ;;  %p604_p8 = scmp.ne.s32.totalorder %s601_s18, 0 }
  0x54   : > { %p605_p10 = scmp.ge.s32.totalorder %s421_s9, 2  ;;  %s199_s25 = scalar_lea.sflag [#allocation4], %s198_s24 }
  0x56   : > { %p284_p0 = pnand %p605_p10, %p604_p8 }
  0x58   : > { %404 = dma.done.wait (!%p284_p0), %s199_s25, 1536  }
  0x59   : > { %406 = vsyncadd (!%p284_p0), %s199_s25, 4294965760  ;;  %p14_p2 = scmp.ge.s32.totalorder %s464_s12, 4   ;;  %s606_s6 = smov %s413_s7 }
  0x5a   : > { %s607_s7 = smov %s417_s8  ;;  %s608_s8 = smov %s476_s15 }
  0x5b   : > { %s609_s9 = smov %s464_s12  ;;  %16 = sbr.rel (!%p14_p2) target bundleno = 5 (0x5), region = 69 }
  0x62   :  { %204 = vsyncpa [#allocation3], 1 }
  0x63   :  { %206 = vsyncpa [#allocation3 + $0x1], 1 }
  0x64   :  { %207 = vsyncpa [#allocation4], 1 }
  0x65   :  { %209 = vsyncpa [#allocation4 + $0x1], 1 }

</bundles_post_ra>
